<compile_context>
chip_gen: v7x
topology: tpu7x:2x2x1
jax: 0.10.0
libtpu: 0.0.40
codegen_flags: <defaults>
</compile_context>

<pallas_src>
import jax
import jax.numpy as jnp
from jax import lax
from jax.experimental import pallas as pl
from jax.experimental.pallas import tpu as pltpu

_OUT_ROWS = 8  # sublane-aligned replication of the final output row


def _critic_kernel(s_ref, e_ref,
                   w1s_ref, w1e_ref, b1_ref, g_ref, beta_ref,
                   w2_ref, b2_ref,
                   w3_ref, b3_ref,
                   w4t_ref, b4_ref,
                   o_ref):
    # ---- Linear(D_total, 128) + ReLU, with the concat fused into two dots ----
    h = (jnp.dot(s_ref[...], w1s_ref[...], preferred_element_type=jnp.float32)
         + jnp.dot(e_ref[...], w1e_ref[...], preferred_element_type=jnp.float32)
         + b1_ref[...])
    h = jnp.maximum(h, 0.0)

    # ---- LayerNorm(128), eps = 1e-5, elementwise affine (one-pass stats) ----
    mean = jnp.mean(h, axis=-1, keepdims=True)
    mean_sq = jnp.mean(h * h, axis=-1, keepdims=True)
    var = mean_sq - mean * mean
    h = (h - mean) * lax.rsqrt(var + 1e-5)
    h = h * g_ref[...] + beta_ref[...]

    # ---- Linear(128, 64) + ReLU ----
    h = jnp.dot(h, w2_ref[...], preferred_element_type=jnp.float32) + b2_ref[...]
    h = jnp.maximum(h, 0.0)

    # ---- Linear(64, 32) + ReLU ----
    h = jnp.dot(h, w3_ref[...], preferred_element_type=jnp.float32) + b3_ref[...]
    h = jnp.maximum(h, 0.0)

    # ---- Linear(32, 1), emitted lane-dense ----
    # Contract the 32-dim feature axes of w4t (8,32) and h (tile_b,32)
    # (A @ B^T form, same dimension numbers as flash-attention's q @ k^T),
    # giving an (8, tile_b) result: the per-row scalar sits on the lane axis
    # so the store is a full, unmasked block.
    y = lax.dot_general(w4t_ref[...], h,
                        dimension_numbers=(((1,), (1,)), ((), ())),
                        preferred_element_type=jnp.float32)
    o_ref[...] = y + b4_ref[...]


def _round_up(x, m):
    return ((x + m - 1) // m) * m


def _num_tensorcores_per_chip():
    """Best-effort TensorCore count per device (used only to pick tile splits)."""
    try:
        dev = jax.devices()[0]
        if dev.platform != "tpu":
            return 1
        kind = (getattr(dev, "device_kind", "") or "").lower()
    except Exception:
        return 1
    # Single-TensorCore parts: v2/v3 (per-core devices) and the lite/e parts.
    if any(tag in kind for tag in ("v2", "v3", "lite", "v5e", "v6e")):
        return 1
    # v4 / v5p (megacore) and v7x expose 2 TensorCores per device.
    return 2


def critic_forward(state, extra_features, params, *, max_tile_b=1024):
    """Runs the Critic MLP.  state: (B, input_dim), extra: (B, extra_dim) -> (B, 1)."""
    state = state.astype(jnp.float32)
    extra_features = extra_features.astype(jnp.float32)
    b, input_dim = state.shape
    b2_, extra_dim = extra_features.shape
    assert b2_ == b, "state / extra_features batch mismatch"

    (w1, b1, gamma, beta, w2, b2, w3, b3, w4, b4) = params
    # Split W1 row-wise so the concat is fused into two matmuls in the kernel.
    w1s = w1[:input_dim]
    w1e = w1[input_dim:]
    # Final weight, transposed and replicated to 8 sublane-aligned rows.
    w4t = jnp.broadcast_to(w4.reshape(1, -1), (_OUT_ROWS, w4.shape[0]))

    # --- batch tiling: big balanced tiles, >=2 "parallel" steps only on 2-TC chips ---
    n_cores = _num_tensorcores_per_chip()
    if b <= max_tile_b and (n_cores == 1 or b < 256):
        tile_b = b                      # single full-extent tile, no partial blocks
        n_steps = 1
    else:
        n_steps = max(pl.cdiv(b, max_tile_b), n_cores)
        tile_b = _round_up(pl.cdiv(b, n_steps), 128)   # 128-aligned for the out block
        n_steps = pl.cdiv(b, tile_b)

    def batch_spec(minor):
        return pl.BlockSpec((tile_b, minor), lambda i: (i, 0))

    def full_spec(shape):
        # Whole-array block, same block for every batch tile (weights/biases):
        # constant index_map => Pallas DMAs these once and keeps them resident.
        return pl.BlockSpec(shape, lambda i: tuple(0 for _ in shape))

    # Raise the scoped-VMEM limit only when huge tiles would brush v5e's 16 MiB default.
    lane = lambda d: _round_up(d, 128)
    blk_bytes = 4 * tile_b * (lane(input_dim) + lane(extra_dim) + _OUT_ROWS)
    cp_kwargs = {}
    if 2 * blk_bytes > (12 << 20):
        cp_kwargs["vmem_limit_bytes"] = min(2 * blk_bytes + (16 << 20), 60 << 20)

    out = pl.pallas_call(
        _critic_kernel,
        out_shape=jax.ShapeDtypeStruct((_OUT_ROWS, b), jnp.float32),
        grid_spec=pltpu.PrefetchScalarGridSpec(
            num_scalar_prefetch=0,
            grid=(n_steps,),
            in_specs=[
                batch_spec(input_dim),                 # state tile
                batch_spec(extra_dim),                 # extra tile
                full_spec(w1s.shape), full_spec(w1e.shape), full_spec(b1.shape),
                full_spec(gamma.shape), full_spec(beta.shape),
                full_spec(w2.shape), full_spec(b2.shape),
                full_spec(w3.shape), full_spec(b3.shape),
                full_spec(w4t.shape), full_spec(b4.shape),
            ],
            out_specs=pl.BlockSpec((_OUT_ROWS, tile_b), lambda i: (0, i)),
        ),
        compiler_params=pltpu.CompilerParams(
            dimension_semantics=("parallel",), **cp_kwargs),
    )(state, extra_features,
      w1s, w1e, b1, gamma, beta, w2, b2, w3, b3, w4t, b4)

    # All _OUT_ROWS rows are identical; row 0, reshaped to the module's (B, 1).
    return out[0, :, None]


def init_params(key, input_dim, extra_dim=5):
    """Deterministic synthetic parameters matching the PyTorch module's shapes."""
    d_total = input_dim + extra_dim
    dims = [(d_total, 128), (128, 64), (64, 32), (32, 1)]
    keys = jax.random.split(key, len(dims))
    ws, bs = [], []
    for k, (din, dout) in zip(keys, dims):
        bound = 1.0 / jnp.sqrt(din)
        kw, kb = jax.random.split(k)
        ws.append(jax.random.uniform(kw, (din, dout), jnp.float32, -bound, bound))
        bs.append(jax.random.uniform(kb, (1, dout), jnp.float32, -bound, bound))
    gamma = jnp.ones((1, 128), jnp.float32)   # LayerNorm weight
    beta = jnp.zeros((1, 128), jnp.float32)   # LayerNorm bias
    return (ws[0], bs[0], gamma, beta, ws[1], bs[1], ws[2], bs[2], ws[3], bs[3])


def _reference(state, extra_features, params):
    """Pure-JAX reference of the PyTorch forward for a correctness check."""
    (w1, b1, gamma, beta, w2, b2, w3, b3, w4, b4) = params
    x = jnp.concatenate([state, extra_features], axis=-1)
    h = jnp.maximum(x @ w1 + b1, 0.0)
    mean = jnp.mean(h, axis=-1, keepdims=True)
    var = jnp.mean((h - mean) ** 2, axis=-1, keepdims=True)
    h = (h - mean) / jnp.sqrt(var + 1e-5) * gamma + beta
    h = jnp.maximum(h @ w2 + b2, 0.0)
    h = jnp.maximum(h @ w3 + b3, 0.0)
    return h @ w4 + b4


if __name__ == "__main__":
    key = jax.random.PRNGKey(0)
    k_state, k_extra, k_params = jax.random.split(key, 3)

    batch = 16          # small demo shapes; wrapper tiles arbitrary batches
    input_dim = 16
    extra_dim = 5

    state = jax.random.normal(k_state, (batch, input_dim), jnp.float32)
    extra_features = jax.random.normal(k_extra, (batch, extra_dim), jnp.float32)
    params = init_params(k_params, input_dim, extra_dim)

    out = critic_forward(state, extra_features, params)
    out = jax.block_until_ready(out)

    ref = _reference(state, extra_features, params)
    assert out.shape == (batch, 1)
    assert jnp.allclose(out, ref, atol=1e-4, rtol=1e-4), "mismatch vs reference"

    print("KERNEL_OK")
</pallas_src>

<mosaic_0001>
module attributes {stable_mosaic.version = 11 : i64} {
  func.func @_critic_kernel(%arg0: i32, %arg1: memref<16x16xf32, #tpu.memory_space<vmem>>, %arg2: memref<16x5xf32, #tpu.memory_space<vmem>>, %arg3: memref<16x128xf32, #tpu.memory_space<vmem>>, %arg4: memref<5x128xf32, #tpu.memory_space<vmem>>, %arg5: memref<1x128xf32, #tpu.memory_space<vmem>>, %arg6: memref<1x128xf32, #tpu.memory_space<vmem>>, %arg7: memref<1x128xf32, #tpu.memory_space<vmem>>, %arg8: memref<128x64xf32, #tpu.memory_space<vmem>>, %arg9: memref<1x64xf32, #tpu.memory_space<vmem>>, %arg10: memref<64x32xf32, #tpu.memory_space<vmem>>, %arg11: memref<1x32xf32, #tpu.memory_space<vmem>>, %arg12: memref<8x32xf32, #tpu.memory_space<vmem>>, %arg13: memref<1x1xf32, #tpu.memory_space<vmem>>, %arg14: memref<8x16xf32, #tpu.memory_space<vmem>>) attributes {dimension_semantics = [#tpu.dimension_semantics<parallel>], iteration_bounds = array<i64: 1>, scalar_prefetch = 0 : i64, scratch_operands = 0 : i64, tpu.core_type = #tpu.core_type<tc>, window_params = [{transform_indices = @transform_0, window_bounds = array<i64: 16, 16>}, {transform_indices = @transform_1, window_bounds = array<i64: 16, 5>}, {pipeline_mode = #tpu.pipeline_mode<synchronous>, transform_indices = @transform_2, window_bounds = array<i64: 16, 128>}, {pipeline_mode = #tpu.pipeline_mode<synchronous>, transform_indices = @transform_3, window_bounds = array<i64: 5, 128>}, {pipeline_mode = #tpu.pipeline_mode<synchronous>, transform_indices = @transform_4, window_bounds = array<i64: 1, 128>}, {pipeline_mode = #tpu.pipeline_mode<synchronous>, transform_indices = @transform_5, window_bounds = array<i64: 1, 128>}, {pipeline_mode = #tpu.pipeline_mode<synchronous>, transform_indices = @transform_6, window_bounds = array<i64: 1, 128>}, {pipeline_mode = #tpu.pipeline_mode<synchronous>, transform_indices = @transform_7, window_bounds = array<i64: 128, 64>}, {pipeline_mode = #tpu.pipeline_mode<synchronous>, transform_indices = @transform_8, window_bounds = array<i64: 1, 64>}, {pipeline_mode = #tpu.pipeline_mode<synchronous>, transform_indices = @transform_9, window_bounds = array<i64: 64, 32>}, {pipeline_mode = #tpu.pipeline_mode<synchronous>, transform_indices = @transform_10, window_bounds = array<i64: 1, 32>}, {pipeline_mode = #tpu.pipeline_mode<synchronous>, transform_indices = @transform_11, window_bounds = array<i64: 8, 32>}, {pipeline_mode = #tpu.pipeline_mode<synchronous>, transform_indices = @transform_12, window_bounds = array<i64: 1, 1>}, {transform_indices = @transform_13, window_bounds = array<i64: 8, 16>}]} {
    %c0 = arith.constant 0 : index
    %c0_0 = arith.constant 0 : index
    %0 = vector.load %arg1[%c0, %c0_0] : memref<16x16xf32, #tpu.memory_space<vmem>>, vector<16x16xf32>
    %c0_1 = arith.constant 0 : index
    %c0_2 = arith.constant 0 : index
    %1 = vector.load %arg3[%c0_1, %c0_2] : memref<16x128xf32, #tpu.memory_space<vmem>>, vector<16x128xf32>
    %cst = arith.constant dense<0.000000e+00> : vector<16x128xf32>
    %2 = tpu.matmul %0, %1, %cst {dimension_numbers = #tpu.dot_dimension_numbers<[1], [0], [0], [1], [0, 0, 1, 1], [], []>} : vector<16x16xf32>, vector<16x128xf32>, vector<16x128xf32> -> vector<16x128xf32>
    %c0_3 = arith.constant 0 : index
    %c0_4 = arith.constant 0 : index
    %3 = vector.load %arg2[%c0_3, %c0_4] : memref<16x5xf32, #tpu.memory_space<vmem>>, vector<16x5xf32>
    %c0_5 = arith.constant 0 : index
    %c0_6 = arith.constant 0 : index
    %4 = vector.load %arg4[%c0_5, %c0_6] : memref<5x128xf32, #tpu.memory_space<vmem>>, vector<5x128xf32>
    %cst_7 = arith.constant dense<0.000000e+00> : vector<16x128xf32>
    %5 = tpu.matmul %3, %4, %cst_7 {dimension_numbers = #tpu.dot_dimension_numbers<[1], [0], [0], [1], [0, 0, 1, 1], [], []>} : vector<16x5xf32>, vector<5x128xf32>, vector<16x128xf32> -> vector<16x128xf32>
    %6 = arith.addf %2, %5 : vector<16x128xf32>
    %c0_8 = arith.constant 0 : index
    %c0_9 = arith.constant 0 : index
    %7 = vector.load %arg5[%c0_8, %c0_9] : memref<1x128xf32, #tpu.memory_space<vmem>>, vector<1x128xf32>
    %8 = vector.broadcast %7 : vector<1x128xf32> to vector<16x128xf32>
    %9 = arith.addf %6, %8 : vector<16x128xf32>
    %cst_10 = arith.constant 0.000000e+00 : f32
    %10 = vector.broadcast %cst_10 : f32 to vector<16x128xf32>
    %11 = arith.maximumf %9, %10 : vector<16x128xf32>
    %cst_11 = arith.constant dense<0.000000e+00> : vector<16xf32>
    %12 = vector.multi_reduction <add>, %11, %cst_11 [1] : vector<16x128xf32> to vector<16xf32>
    %13 = vector.shape_cast %12 : vector<16xf32> to vector<16x1xf32>
    %cst_12 = arith.constant 1.280000e+02 : f32
    %14 = vector.broadcast %cst_12 : f32 to vector<16x1xf32>
    %15 = arith.divf %13, %14 : vector<16x1xf32>
    %16 = arith.mulf %11, %11 : vector<16x128xf32>
    %cst_13 = arith.constant dense<0.000000e+00> : vector<16xf32>
    %17 = vector.multi_reduction <add>, %16, %cst_13 [1] : vector<16x128xf32> to vector<16xf32>
    %18 = vector.shape_cast %17 : vector<16xf32> to vector<16x1xf32>
    %cst_14 = arith.constant 1.280000e+02 : f32
    %19 = vector.broadcast %cst_14 : f32 to vector<16x1xf32>
    %20 = arith.divf %18, %19 : vector<16x1xf32>
    %21 = arith.mulf %15, %15 : vector<16x1xf32>
    %22 = arith.subf %20, %21 : vector<16x1xf32>
    %23 = vector.broadcast %15 : vector<16x1xf32> to vector<16x128xf32>
    %24 = arith.subf %11, %23 : vector<16x128xf32>
    %cst_15 = arith.constant 9.99999974E-6 : f32
    %25 = vector.broadcast %cst_15 : f32 to vector<16x1xf32>
    %26 = arith.addf %22, %25 : vector<16x1xf32>
    %27 = math.rsqrt %26 : vector<16x1xf32>
    %28 = vector.broadcast %27 : vector<16x1xf32> to vector<16x128xf32>
    %29 = arith.mulf %24, %28 : vector<16x128xf32>
    %c0_16 = arith.constant 0 : index
    %c0_17 = arith.constant 0 : index
    %30 = vector.load %arg6[%c0_16, %c0_17] : memref<1x128xf32, #tpu.memory_space<vmem>>, vector<1x128xf32>
    %31 = vector.broadcast %30 : vector<1x128xf32> to vector<16x128xf32>
    %32 = arith.mulf %29, %31 : vector<16x128xf32>
    %c0_18 = arith.constant 0 : index
    %c0_19 = arith.constant 0 : index
    %33 = vector.load %arg7[%c0_18, %c0_19] : memref<1x128xf32, #tpu.memory_space<vmem>>, vector<1x128xf32>
    %34 = vector.broadcast %33 : vector<1x128xf32> to vector<16x128xf32>
    %35 = arith.addf %32, %34 : vector<16x128xf32>
    %c0_20 = arith.constant 0 : index
    %c0_21 = arith.constant 0 : index
    %36 = vector.load %arg8[%c0_20, %c0_21] : memref<128x64xf32, #tpu.memory_space<vmem>>, vector<128x64xf32>
    %cst_22 = arith.constant dense<0.000000e+00> : vector<16x64xf32>
    %37 = tpu.matmul %35, %36, %cst_22 {dimension_numbers = #tpu.dot_dimension_numbers<[1], [0], [0], [1], [0, 0, 1, 1], [], []>} : vector<16x128xf32>, vector<128x64xf32>, vector<16x64xf32> -> vector<16x64xf32>
    %c0_23 = arith.constant 0 : index
    %c0_24 = arith.constant 0 : index
    %38 = vector.load %arg9[%c0_23, %c0_24] : memref<1x64xf32, #tpu.memory_space<vmem>>, vector<1x64xf32>
    %39 = vector.broadcast %38 : vector<1x64xf32> to vector<16x64xf32>
    %40 = arith.addf %37, %39 : vector<16x64xf32>
    %cst_25 = arith.constant 0.000000e+00 : f32
    %41 = vector.broadcast %cst_25 : f32 to vector<16x64xf32>
    %42 = arith.maximumf %40, %41 : vector<16x64xf32>
    %c0_26 = arith.constant 0 : index
    %c0_27 = arith.constant 0 : index
    %43 = vector.load %arg10[%c0_26, %c0_27] : memref<64x32xf32, #tpu.memory_space<vmem>>, vector<64x32xf32>
    %cst_28 = arith.constant dense<0.000000e+00> : vector<16x32xf32>
    %44 = tpu.matmul %42, %43, %cst_28 {dimension_numbers = #tpu.dot_dimension_numbers<[1], [0], [0], [1], [0, 0, 1, 1], [], []>} : vector<16x64xf32>, vector<64x32xf32>, vector<16x32xf32> -> vector<16x32xf32>
    %c0_29 = arith.constant 0 : index
    %c0_30 = arith.constant 0 : index
    %45 = vector.load %arg11[%c0_29, %c0_30] : memref<1x32xf32, #tpu.memory_space<vmem>>, vector<1x32xf32>
    %46 = vector.broadcast %45 : vector<1x32xf32> to vector<16x32xf32>
    %47 = arith.addf %44, %46 : vector<16x32xf32>
    %cst_31 = arith.constant 0.000000e+00 : f32
    %48 = vector.broadcast %cst_31 : f32 to vector<16x32xf32>
    %49 = arith.maximumf %47, %48 : vector<16x32xf32>
    %c0_32 = arith.constant 0 : index
    %c0_33 = arith.constant 0 : index
    %50 = vector.load %arg12[%c0_32, %c0_33] : memref<8x32xf32, #tpu.memory_space<vmem>>, vector<8x32xf32>
    %cst_34 = arith.constant dense<0.000000e+00> : vector<8x16xf32>
    %51 = tpu.matmul %50, %49, %cst_34 {dimension_numbers = #tpu.dot_dimension_numbers<[1], [1], [0], [0], [0, 0, 1, 0], [], []>} : vector<8x32xf32>, vector<16x32xf32>, vector<8x16xf32> -> vector<8x16xf32>
    %c0_35 = arith.constant 0 : index
    %c0_36 = arith.constant 0 : index
    %52 = vector.load %arg13[%c0_35, %c0_36] : memref<1x1xf32, #tpu.memory_space<vmem>>, vector<1x1xf32>
    %53 = vector.broadcast %52 : vector<1x1xf32> to vector<8x16xf32>
    %54 = arith.addf %51, %53 : vector<8x16xf32>
    %c0_37 = arith.constant 0 : index
    %c0_38 = arith.constant 0 : index
    %55 = vector.load %arg14[%c0_37, %c0_38] : memref<8x16xf32, #tpu.memory_space<vmem>>, vector<8x16xf32>
    tpu.vector_store %arg14[%c0_37, %c0_38], %54 {strides = array<i32>} : memref<8x16xf32, #tpu.memory_space<vmem>>, vector<8x16xf32>,
    return
  }
  func.func @transform_0(%arg0: i32) -> (i32, i32) {
    %c0_i32 = arith.constant 0 : i32
    %c0_i32_0 = arith.constant 0 : i32
    return %arg0, %c0_i32 : i32, i32
  }
  func.func @transform_1(%arg0: i32) -> (i32, i32) {
    %c0_i32 = arith.constant 0 : i32
    %c0_i32_0 = arith.constant 0 : i32
    return %arg0, %c0_i32 : i32, i32
  }
  func.func @transform_2(%arg0: i32) -> (i32, i32) {
    %c0_i32 = arith.constant 0 : i32
    %c0_i32_0 = arith.constant 0 : i32
    %c0_i32_1 = arith.constant 0 : i32
    return %c0_i32, %c0_i32_0 : i32, i32
  }
  func.func @transform_3(%arg0: i32) -> (i32, i32) {
    %c0_i32 = arith.constant 0 : i32
    %c0_i32_0 = arith.constant 0 : i32
    %c0_i32_1 = arith.constant 0 : i32
    return %c0_i32, %c0_i32_0 : i32, i32
  }
  func.func @transform_4(%arg0: i32) -> (i32, i32) {
    %c0_i32 = arith.constant 0 : i32
    %c0_i32_0 = arith.constant 0 : i32
    %c0_i32_1 = arith.constant 0 : i32
    return %c0_i32, %c0_i32_0 : i32, i32
  }
  func.func @transform_5(%arg0: i32) -> (i32, i32) {
    %c0_i32 = arith.constant 0 : i32
    %c0_i32_0 = arith.constant 0 : i32
    %c0_i32_1 = arith.constant 0 : i32
    return %c0_i32, %c0_i32_0 : i32, i32
  }
  func.func @transform_6(%arg0: i32) -> (i32, i32) {
    %c0_i32 = arith.constant 0 : i32
    %c0_i32_0 = arith.constant 0 : i32
    %c0_i32_1 = arith.constant 0 : i32
    return %c0_i32, %c0_i32_0 : i32, i32
  }
  func.func @transform_7(%arg0: i32) -> (i32, i32) {
    %c0_i32 = arith.constant 0 : i32
    %c0_i32_0 = arith.constant 0 : i32
    %c0_i32_1 = arith.constant 0 : i32
    return %c0_i32, %c0_i32_0 : i32, i32
  }
  func.func @transform_8(%arg0: i32) -> (i32, i32) {
    %c0_i32 = arith.constant 0 : i32
    %c0_i32_0 = arith.constant 0 : i32
    %c0_i32_1 = arith.constant 0 : i32
    return %c0_i32, %c0_i32_0 : i32, i32
  }
  func.func @transform_9(%arg0: i32) -> (i32, i32) {
    %c0_i32 = arith.constant 0 : i32
    %c0_i32_0 = arith.constant 0 : i32
    %c0_i32_1 = arith.constant 0 : i32
    return %c0_i32, %c0_i32_0 : i32, i32
  }
  func.func @transform_10(%arg0: i32) -> (i32, i32) {
    %c0_i32 = arith.constant 0 : i32
    %c0_i32_0 = arith.constant 0 : i32
    %c0_i32_1 = arith.constant 0 : i32
    return %c0_i32, %c0_i32_0 : i32, i32
  }
  func.func @transform_11(%arg0: i32) -> (i32, i32) {
    %c0_i32 = arith.constant 0 : i32
    %c0_i32_0 = arith.constant 0 : i32
    %c0_i32_1 = arith.constant 0 : i32
    return %c0_i32, %c0_i32_0 : i32, i32
  }
  func.func @transform_12(%arg0: i32) -> (i32, i32) {
    %c0_i32 = arith.constant 0 : i32
    %c0_i32_0 = arith.constant 0 : i32
    %c0_i32_1 = arith.constant 0 : i32
    return %c0_i32, %c0_i32_0 : i32, i32
  }
  func.func @transform_13(%arg0: i32) -> (i32, i32) {
    %c0_i32 = arith.constant 0 : i32
    %c0_i32_0 = arith.constant 0 : i32
    return %c0_i32, %arg0 : i32, i32
  }
}

</mosaic_0001>

<bundles_post_ra>
// kernel: tpu_custom_call.1
= control target key start
LH: loop header
LB: loop body
LE: loop exit
PB: predicated region body
PF: predicated region fallthrough
CT: control target
= control target key end

     0   :  { %s1018_s0 = inlined_call_operand.vmem [shape: f32[16,16], index: 0, kind: input, shape index: {}]   ;;  %s1019_s1 = inlined_call_operand.vmem [shape: f32[16,5], index: 1, kind: input, shape index: {}]   ;;  %s1020_s2 = inlined_call_operand.vmem [shape: f32[16,128], index: 2, kind: input, shape index: {}]   ;;  %s1021_s3 = inlined_call_operand.vmem [shape: f32[5,128], index: 3, kind: input, shape index: {}]   ;;  %s1022_s4 = inlined_call_operand.vmem [shape: f32[1,128], index: 4, kind: input, shape index: {}]   ;;  %s1023_s5 = inlined_call_operand.vmem [shape: f32[1,128], index: 5, kind: input, shape index: {}]   ;;  %s1024_s6 = inlined_call_operand.vmem [shape: f32[1,128], index: 6, kind: input, shape index: {}]   ;;  %s1025_s7 = inlined_call_operand.vmem [shape: f32[128,64], index: 7, kind: input, shape index: {}]   ;;  %s1026_s8 = inlined_call_operand.vmem [shape: f32[1,64], index: 8, kind: input, shape index: {}]   ;;  %s1027_s9 = inlined_call_operand.vmem [shape: f32[64,32], index: 9, kind: input, shape index: {}]   ;;  %s1028_s10 = inlined_call_operand.vmem [shape: f32[1,32], index: 10, kind: input, shape index: {}]   ;;  %s1029_s11 = inlined_call_operand.vmem [shape: f32[8,32], index: 11, kind: input, shape index: {}]   ;;  %s1030_s12 = inlined_call_operand.<no memory space> [shape: f32[1,1], index: 12, kind: input, shape index: {}]   ;;  %s1031_s13 = inlined_call_operand.hbm [shape: f32[8,16], index: 13, kind: output, shape index: {}]  }
   0x1   :  { %v18_v0 = vstv %s1030_s12 }
   0x2   :  { %19 = vst [vmem:[#allocation2] sm:$0x1] %v18_v0 }
   0x3   :  { %v53_v1 = vld [vmem:[%s1021_s3] sm:$0x1f]  ;;  %vm61_vm0 = vcmask 1044480   ;;  %vm54_vm1 = vcmask 39936   ;;  %v52_v3 = vld [vmem:[%s1019_s1 + $0x8] sm:$0xff]  ;;  %vm140_vm2 = vcmask 130048  }
   0x4   :  { %v51_v2 = vld [vmem:[%s1019_s1] sm:$0xff]  ;;  %637 = vmatprep.subr.msk.mxu0 %vm61_vm0, %v53_v1  ;;  %v50_v5 = vld [vmem:[%s1020_s2 + $0x8] sm:$0xff] }
   0x5   :  { %639 = vmatprep.mubr.msk.f32.mxu0 %vm54_vm1, %v51_v2  ;;  %v49_v4 = vld [vmem:[%s1020_s2] sm:$0xff]  ;;  %638 = vmatpush3.msk.msra.mxu0 %vm61_vm0, %v53_v1 }
   0x6   :  { %v47_v6 = vld [vmem:[%s1018_s0] sm:$0xff]  ;;  %v710_v7 = vpack.c.bf16 %v50_v5, %v49_v4 }
   0x7   :  { %20 = vsyncpa [#allocation4], 0  ;;  %640 = vmatmul.mubr.msk.f32.vlgmr.msra.gmra.mrb[0].mxu0 %vm54_vm1, %v52_v3  ;;  %v48_v8 = vld [vmem:[%s1018_s0 + $0x8] sm:$0xff]  ;;  %v278_v9 = vld [vmem:[%s1025_s7] sm:$0xff]  ;;  %vm393_vm3 = vcmask 523264   ;;  %vm803_vm4 = vmmov 0  }
   0x8   :  { %711 = vmatprep.subr.bf16.mxu0 %v710_v7  ;;  %646 = vmatprep.mubr.msk.f32.mxu0 %vm140_vm2, %v47_v6  ;;  %v279_v10 = vld [vmem:[%s1025_s7 + $0x8] sm:$0xff]  ;;  %v588_v12 = vld [vmem:[%s1022_s4] ss:$0 sm:$0xff]  ;;  %v280_v21 = vld [vmem:[%s1025_s7 + $0x10] sm:$0xff]  ;;  %vm488_vm5 = vcmask 261120   ;;  %s806_s27 = smov [#allocation3]  }
   0x9   :  { %713 = vmatpush3.bf16.msra.mxu0 %v710_v7  ;;  %v714_v11 = vpack.c.bf16 %v279_v10, %v278_v9  ;;  %v281_v22 = vld [vmem:[%s1025_s7 + $0x18] sm:$0xff]  ;;  %v282_v24 = vld [vmem:[%s1025_s7 + $0x20] sm:$0xff]  ;;  %v283_v25 = vld [vmem:[%s1025_s7 + $0x28] sm:$0xff]  ;;  %s575_s28 = sshll.u32 %s806_s27, 4  ;;  %s576_s28 = int_to_ptr.vmem [resolvable:$true] %s575_s28 }
   0xa   :  { %v718_v23 = vpack.c.bf16 %v281_v22, %v280_v21  ;;  %v722_v26 = vpack.c.bf16 %v283_v25, %v282_v24  ;;  %v284_v27 = vld [vmem:[%s1025_s7 + $0x30] sm:$0xff]  ;;  %v285_v28 = vld [vmem:[%s1025_s7 + $0x38] sm:$0xff]  ;;  %v286_v30 = vld [vmem:[%s1025_s7 + $0x40] sm:$0xff]  ;;  %v804_v24 = vmov 0.0   ;;  %p783_p1 = scmp.lt.s32.totalorder %s576_s28, %s576_s28 }
   0xb   :  { %715 = vmatprep.subr.bf16.mxu1 %v714_v11  ;;  %v726_v29 = vpack.c.bf16 %v285_v28, %v284_v27  ;;  %v287_v31 = vld [vmem:[%s1025_s7 + $0x48] sm:$0xff]  ;;  %v288_v33 = vld [vmem:[%s1025_s7 + $0x50] sm:$0xff]  ;;  %v289_v34 = vld [vmem:[%s1025_s7 + $0x58] sm:$0xff] }
   0xc   :  { %717 = vmatpush3.bf16.msra.mxu1 %v714_v11  ;;  %v730_v32 = vpack.c.bf16 %v287_v31, %v286_v30  ;;  %v290_v35 = vld [vmem:[%s1025_s7 + $0x60] sm:$0xff]  ;;  %v734_v36 = vpack.c.bf16 %v289_v34, %v288_v33  ;;  %v291_v37 = vld [vmem:[%s1025_s7 + $0x68] sm:$0xff]  ;;  %v292_v39 = vld [vmem:[%s1025_s7 + $0x70] sm:$0xff] }
   0xd   :  { %719 = vmatprep.subr.bf16.mxu1 %v718_v23  ;;  %v738_v38 = vpack.c.bf16 %v291_v37, %v290_v35  ;;  %v293_v40 = vld [vmem:[%s1025_s7 + $0x78] sm:$0xff]  ;;  %v378_v42 = vld [vmem:[%s1027_s9] sm:$0xff]  ;;  %v379_v43 = vld [vmem:[%s1027_s9 + $0x8] sm:$0xff] }
   0xe   :  { %v742_v41 = vpack.c.bf16 %v293_v40, %v292_v39  ;;  %v380_v44 = vld [vmem:[%s1027_s9 + $0x10] sm:$0xff]  ;;  %v746_v45 = vpack.c.bf16 %v379_v43, %v378_v42  ;;  %v381_v46 = vld [vmem:[%s1027_s9 + $0x18] sm:$0xff]  ;;  %v382_v48 = vld [vmem:[%s1027_s9 + $0x20] sm:$0xff] }
   0xf   :  { %647 = vmatmul.mubr.msk.f32.vlgmr.msra.gmra.mrb[0].mxu0 %vm140_vm2, %v48_v8  ;;  %v750_v47 = vpack.c.bf16 %v381_v46, %v380_v44  ;;  %v383_v49 = vld [vmem:[%s1027_s9 + $0x28] sm:$0xff]  ;;  %v589_v3 = vld [vmem:[%s1023_s5] ss:$0 sm:$0xff]  ;;  %vm764_vm6 = vmpackc.low %vm488_vm5, %vm488_vm5 }
  0x10   :  { %721 = vmatpush3.bf16.msra.mxu1 %v718_v23  ;;  %747 = vmatprep.subr.bf16.mxu0 %v746_v45  ;;  %v754_v50 = vpack.c.bf16 %v383_v49, %v382_v48  ;;  %v590_v5 = vld [vmem:[%s1024_s6] ss:$0 sm:$0xff]  ;;  %v802_v23 = vmov 0.0|0.0  }
  0x11   :  { %723 = vmatprep.subr.bf16.mxu1 %v722_v26  ;;  %749 = vmatpush3.bf16.msra.mxu0 %v746_v45  ;;  %v595_v25 = vld [vmem:[#allocation2] ss:$0 sm:$0xff] }
  0x12   :  { %751 = vmatprep.subr.bf16.mxu0 %v750_v47  ;;  %v592_v27 = vld [vmem:[%s1028_s10] ss:$0 sm:$0xff]  ;;  %s778_s10 = scalar_lea.vmem %s576_s28, 128 }
  0x13   :  { %v477_v35 = vld [vmem:[%s1029_s11] sm:$0xff]  ;;  %p779_p0 = scmp.ne.s32.totalorder %s576_s28, %s778_s10  ;;  %p784_p2 = scmp.lt.s32.totalorder %s778_s10, %s778_s10 }
  0x14   :  { %725 = vmatpush3.bf16.msra.mxu1 %v722_v26  ;;  %v805_v26 = vmov 0  }
  0x15   :  { %727 = vmatprep.subr.bf16.mxu1 %v726_v29  ;;  %753 = vmatpush3.bf16.msra.mxu0 %v750_v47  ;;  %p785_p3 = por %p784_p2, %p783_p1 }
  0x16   :  { %755 = vmatprep.subr.bf16.mxu0 %v754_v50  ;;  %773 = vset.pattern.permute.xlu0 %v805_v26 }
  0x17   :  { %p786_p4 = pnand %p785_p3, %p779_p0 }
  0x18   :  { %729 = vmatpush3.bf16.msra.mxu1 %v726_v29 }
  0x19   :  { %731 = vmatprep.subr.bf16.mxu1 %v730_v32  ;;  %757 = vmatpush3.bf16.msra.mxu0 %v754_v50 }
  0x1c   :  { %733 = vmatpush3.bf16.msra.mxu1 %v730_v32 }
  0x1d   :  { %735 = vmatprep.subr.bf16.mxu1 %v734_v36 }
  0x20   :  { %737 = vmatpush3.bf16.msra.mxu1 %v734_v36 }
  0x21   :  { %739 = vmatprep.subr.bf16.mxu1 %v738_v38 }
  0x24   :  { %741 = vmatpush3.bf16.msra.mxu1 %v738_v38 }
  0x25   :  { %743 = vmatprep.subr.bf16.mxu1 %v742_v41 }
  0x28   :  { %745 = vmatpush3.bf16.msra.mxu1 %v742_v41 }
  0xe2   :  { %v648_v13 = vpop.f32.mrb[0].mxu0 }
  0xe3   :  { %v213_v14 = vpop.f32.mrb[1].mxu0  ;;  %v230_v15 = vadd.f32 %v648_v13, %v588_v12  ;;  %v384_v13 = vld [vmem:[%s1027_s9 + $0x30] sm:$0xff] }
  0xe4   :  { %v229_v16 = vadd.f32 %v588_v12, %v213_v14  ;;  %v385_v14 = vld [vmem:[%s1027_s9 + $0x38] sm:$0xff] }
  0xe5   :  { %v914_v18 = vmax.f32 %v230_v15, 0.0  ;;  %v758_v15 = vpack.c.bf16 %v385_v14, %v384_v13 }
  0xe6   :  { %v912_v17 = vmax.f32 %v229_v16, 0.0  ;;  %v591_v16 = vld [vmem:[%s1026_s8] ss:$0 sm:$0xff] }
  0xe7   :  { %v241_v20 = vmul.f32 %v914_v18, %v914_v18  ;;  %759 = vmatprep.subr.bf16.mxu0 %v758_v15 }
  0xe8   :  { %233 = vadd.xlane.f32.xlu0 %v912_v17  ;;  %v240_v19 = vmul.f32 %v912_v17, %v912_v17  ;;  %761 = vmatpush3.bf16.msra.mxu0 %v758_v15 }
  0xe9   :  { %762 = vmatprep.subr.bf16.mxu0 %v802_v23 }
  0xea   :  { %242 = vadd.xlane.f32.xlu1 %v240_v19 }
  0xec   :  { %235 = vadd.xlane.f32.xlu0 %v914_v18 }
  0xee   :  { %244 = vadd.xlane.f32.xlu1 %v241_v20 }
 0x102   :  { %485 = vperm.xlu0 %773, %v595_v25  }
 0x175   :  { %v234_v51 = vpop.xlane.xlu0 %233 }
 0x176   :  { %v238_v52 = vmul.f32 0.0078125, %v234_v51 }
 0x177   :  { %v243_v53 = vpop.xlane.xlu1 %242 }
 0x178   :  { %v248_v54 = vmul.f32 %v238_v52, %v238_v52  ;;  %v246_v55 = vmul.f32 0.0078125, %v243_v53  ;;  %v252_v1 = vsub.f32 %v912_v17, %v238_v52 }
 0x179   :  { %v236_v56 = vpop.xlane.xlu0 %235 }
 0x17a   :  { %v250_v57 = vsub.f32 %v246_v55, %v248_v54  ;;  %v239_v58 = vmul.f32 0.0078125, %v236_v56 }
 0x17b   :  { %v245_v59 = vpop.xlane.xlu1 %244 }
 0x17c   :  { %v254_v60 = vadd.f32 1e-05, %v250_v57  ;;  %v249_v61 = vmul.f32 %v239_v58, %v239_v58  ;;  %v247_v62 = vmul.f32 0.0078125, %v245_v59  ;;  %v253_v6 = vsub.f32 %v914_v18, %v239_v58 }
 0x17e   :  { %774 = vrsqrt.f32 %v254_v60  ;;  %v251_v63 = vsub.f32 %v247_v62, %v249_v61 }
 0x180   :  { %v255_v0 = vadd.f32 1e-05, %v251_v63 }
 0x181   :  { %v486_v36 = vpop.permute.xlu0 %485 }
 0x182   :  { %776 = vrsqrt.f32 %v255_v0 }
 0x188   :  { %v775_v2 = vpop.eup %774 }
 0x189   :  { %v258_v4 = vmul.f32 %v775_v2, %v252_v1 }
 0x18b   :  { %v267_v7 = vmul.f32 %v589_v3, %v258_v4 }
 0x18c   :  { %v777_v8 = vpop.eup %776 }
 0x18d   :  { %v259_v9 = vmul.f32 %v777_v8, %v253_v6  ;;  %v276_v10 = vadd.f32 %v590_v5, %v267_v7 }
 0x18f   :  { %v268_v11 = vmul.f32 %v589_v3, %v259_v9  ;;  %681 = vmatprep.mubr.f32.mxu1 %v276_v10 }
 0x191   :  { %v277_v12 = vadd.f32 %v590_v5, %v268_v11 }
 0x193   :  { %682 = vmatmul.mubr.f32.vlgmr.msra.gmra.mrb[0].mxu1 %v277_v12 }
 0x266   :  { %v683_v17 = vpop.f32.mrb[0].mxu1 }
 0x267   :  { %v373_v18 = vadd.f32 %v683_v17, %v591_v16  ;;  %v367_v19 = vpop.f32.mrb[1].mxu1 }
 0x268   :  { %v368_v20 = vadd.f32 %v591_v16, %v367_v19 }
 0x269   :  { %v377_v22 = vmax.f32 %v373_v18, 0.0 }
 0x26a   :  { %v376_v21 = vmax.f32 %v368_v20, 0.0 }
 0x26c   :  { %700 = vmatprep.mubr.msk.f32.mxu0 %vm393_vm3, %v376_v21 }
 0x26d   :  { %701 = vmatmul.mubr.msk.f32.vlgmr.msra.gmra.mrb[2].mxu0 %vm393_vm3, %v377_v22 }
 0x26e   :  { %707 = vmatprep.mubr.msk.f32.mxu0 %vm803_vm4, %v804_v24 }
 0x340   :  { %v702_v28 = vpop.f32.mrb[2].mxu0 }
 0x341   :  { %v472_v29 = vadd.f32 %v702_v28, %v592_v27  ;;  %v466_v30 = vpop.f32.mrb[3].mxu0 }
 0x342   :  { %v467_v31 = vadd.f32 %v592_v27, %v466_v30 }
 0x343   :  { %v476_v32 = vmax.f32 %v472_v29, 0.0 }
 0x344   :  { %v475_v33 = vmax.f32 %v467_v31, 0.0 }
 0x346   :  { %v763_v34 = vpack.c.bf16 %v476_v32, %v475_v33 }
 0x348   :  { %765 = vmatpush3.bf16.xpose.msk.msra.mxu0 %vm764_vm6, %v763_v34 }
 0x34f   :  { %708 = vmatmul.mubr.msk.f32.vlgmr.msra.gmra.mrb[4].mxu0 %vm488_vm5, %v477_v35 }
 0x422   :  { %v564_v37 = vpop.f32.mrb[4].mxu0 }
 0x423   :  { %v565_v38 = vadd.f32 %v564_v37, %v486_v36  ;;  %v709_v39 = vpop.f32.mrb[5].mxu0 }
 0x425   :  { %568 = vst.msk [vmem:[#allocation3] sm:$0xff] %vm140_vm2, %v565_v38 }
 0x426   :  { %789 = shalt.err (!%p786_p4)
}
 0x427   :  { %s790_s11 = scalar_lea.hbm %s1031_s13, 128 }
 0x428   :  { %p791_p5 = scmp.ne.s32.totalorder %s1031_s13, %s790_s11  ;;  %p794_p6 = scmp.lt.u32.totalorder %s790_s11, %s1031_s13 }
 0x42a   :  { %p796_p7 = pnand %p794_p6, %p791_p5 }
 0x42c   :  { %799 = shalt.err (!%p796_p7)
}
 0x42d   :  { %578 = dma.vmem_to_hbm [thread:$0]  %s576_s28, 128, %s1031_s13, [#allocation4]  }
 0x42e   :  { %800 = dma.done.wait [#allocation4], 128  }
 0x42f   :  { %801 = vsyncadd [#allocation4], 4294967168 }
 0x430   :  { %582 = vsyncpa [#allocation4], 1 }

</bundles_post_ra>
